<compile_context>
chip_gen: v6e
topology: v6e:2x2x1
jax: 0.10.0
libtpu: 0.0.40
codegen_flags: <defaults>
</compile_context>

<pallas_src>
import functools

import jax
import jax.numpy as jnp
from jax import lax
from jax.experimental import pallas as pl
from jax.experimental.pallas import tpu as pltpu


LAMBDA = 0.7


def _round_up(n, m):
    return ((n + m - 1) // m) * m


def _cdiv(a, b):
    return (a + b - 1) // b


def _softmax_lastdim(s):
    m = jnp.max(s, axis=-1, keepdims=True)
    e = jnp.exp(s - m)
    return e * pl.reciprocal(jnp.sum(e, axis=-1, keepdims=True), approx=False)


def _memory_kernel(q_ref, mem_ref, memt_ref, bias_ref, out_ref, *, lam):
    """One row-tile of the memory-augmentation forward.

    q_ref    : (tm, D)   compute dtype (bf16 or f32)
    mem_ref  : (Np, D)   memory, zero-padded to Np rows
    memt_ref : (D, Np)   pre-transposed memory (same padding)
    bias_ref : (1, Np)   f32 additive bias: 0 for valid cols, -1e30 for padding
    out_ref  : (tm, 3*D) lane-dense slab [x_aug | pos | neg]
    """
    q = q_ref[...]
    mem = mem_ref[...]
    memt = memt_ref[...]
    bias = bias_ref[...]                       # (1, Np) f32
    tm = q.shape[0]
    n_pad = mem.shape[0]
    d = mem.shape[1]

    # attention round 1
    s1 = jnp.dot(q, memt, preferred_element_type=jnp.float32) + bias   # (tm, Np)
    a1 = _softmax_lastdim(s1)
    v1 = jnp.dot(a1.astype(mem.dtype), mem,
                 preferred_element_type=jnp.float32)                   # (tm, D)

    # attention round 2
    s2 = jnp.dot(v1.astype(memt.dtype), memt,
                 preferred_element_type=jnp.float32) + bias
    a2 = _softmax_lastdim(s2)
    v2 = jnp.dot(a2.astype(mem.dtype), mem,
                 preferred_element_type=jnp.float32)

    # top-2 on the raw (biased) scores s2 (softmax is monotone); ties -> first
    # occurrence, padded columns carry -1e30 so they are never selected.
    col = lax.broadcasted_iota(jnp.int32, (1, n_pad), 1)               # (1, Np)
    neg_inf = jnp.float32(-jnp.inf)
    max1 = jnp.max(s2, axis=-1, keepdims=True)                         # (tm, 1)
    ind0 = jnp.min(jnp.where(s2 == max1, col, n_pad), axis=-1, keepdims=True)
    hot0 = col == ind0                                                 # (tm, Np)
    s2m = jnp.where(hot0, neg_inf, s2)
    max2 = jnp.max(s2m, axis=-1, keepdims=True)
    ind1 = jnp.min(jnp.where(s2m == max2, col, n_pad), axis=-1, keepdims=True)
    hot1 = col == ind1

    # fused one-hot gather of pos/neg memory rows via a single MXU matmul
    hot = jnp.concatenate([hot0, hot1], axis=0).astype(mem.dtype)      # (2*tm, Np)
    pn = jnp.dot(hot, mem, preferred_element_type=jnp.float32)         # (2*tm, D)
    pos = pn[:tm]
    neg = pn[tm:]

    x_aug = lam * v1 + (1.0 - lam) * v2

    out_ref[:, 0:d] = x_aug.astype(out_ref.dtype)
    out_ref[:, d:2 * d] = pos.astype(out_ref.dtype)
    out_ref[:, 2 * d:3 * d] = neg.astype(out_ref.dtype)


def memory_augmented_forward(x, memory, *, tile_m=1024,
                             compute_dtype=jnp.bfloat16):
    """x: [..., mem_dim], memory: [mem_num, mem_dim].

    Returns (X_aug, query, pos, neg1, neg2) like memeory_augmented.forward.
    `query` is x itself and neg2 == neg1 (exactly as in the PyTorch module).
    Matmuls run in `compute_dtype` with f32 accumulation; pass
    compute_dtype=jnp.float32 for exact-parity math (note: with bf16 scores,
    top-2 indices can differ from the f32 reference when two memory rows score
    within bf16 rounding of each other).
    """
    orig_shape = x.shape
    mem_num, D = memory.shape
    assert orig_shape[-1] == D

    out_dtype = x.dtype
    q2d = x.reshape(-1, D)
    M = q2d.shape[0]

    # Row tile: multiple of 8 (sublane), clamped for tiny inputs.  When M > 8,
    # cap tm so the grid has >= 2 steps (v7x has 2 TensorCores sharded along
    # the "parallel" axis; a grid of 1 would leave one idle).
    tm = max(8, min(_round_up(tile_m, 8), _round_up(M, 8)))
    if M > 8 and _cdiv(M, tm) < 2:
        tm = _round_up(_cdiv(M, 2), 8)
    grid = (_cdiv(M, tm),)       # ragged last block; no host-side zero pad

    # Pad memory rows to a lane-dense multiple of 128; padded columns are
    # suppressed via the additive bias row so they never affect softmax/top-2.
    Np = _round_up(mem_num, 128)
    if Np != mem_num:
        mem_p = jnp.concatenate(
            [memory, jnp.zeros((Np - mem_num, D), memory.dtype)], axis=0)
    else:
        mem_p = memory

    bias = jnp.where(jnp.arange(Np) < mem_num, 0.0, -1e30)
    bias = bias.astype(jnp.float32).reshape(1, Np)

    q_c = q2d.astype(compute_dtype)
    mem_c = mem_p.astype(compute_dtype)
    memt_c = mem_p.T.astype(compute_dtype)   # transposed once, outside kernel

    row_spec = pl.BlockSpec((tm, D), lambda i: (i, 0))
    mem_spec = pl.BlockSpec((Np, D), lambda i: (0, 0))
    memt_spec = pl.BlockSpec((D, Np), lambda i: (0, 0))
    bias_spec = pl.BlockSpec((1, Np), lambda i: (0, 0))
    out_spec = pl.BlockSpec((tm, 3 * D), lambda i: (i, 0))

    cp_kwargs = dict(dimension_semantics=("parallel",))
    if tm >= 1024:
        # f32 intermediates are ~5 KB/row; raise v5e's 16 MiB default scope.
        cp_kwargs["vmem_limit_bytes"] = 32 * 1024 * 1024

    slab = pl.pallas_call(
        functools.partial(_memory_kernel, lam=LAMBDA),
        grid=grid,
        in_specs=[row_spec, mem_spec, memt_spec, bias_spec],
        out_specs=out_spec,
        out_shape=jax.ShapeDtypeStruct((M, 3 * D), out_dtype),
        compiler_params=pltpu.CompilerParams(**cp_kwargs),
    )(q_c, mem_c, memt_c, bias)

    x_aug = slab[:, 0:D].reshape(orig_shape)
    pos = slab[:, D:2 * D].reshape(orig_shape)
    neg1 = slab[:, 2 * D:3 * D].reshape(orig_shape)
    neg2 = neg1                 # module returns the same memory row twice
    query = x                   # identity in the module's forward
    return x_aug, query, pos, neg1, neg2


def _xavier_normal(key, shape):
    fan_out, fan_in = shape    # nn.init.xavier_normal_ on a 2-D (out, in) param
    std = (2.0 / (fan_in + fan_out)) ** 0.5
    return std * jax.random.normal(key, shape, dtype=jnp.float32)


def _reference(x, memory):
    s1 = jax.nn.softmax(x @ memory.T, axis=-1)
    v1 = s1 @ memory
    s2 = jax.nn.softmax(v1 @ memory.T, axis=-1)
    v2 = s2 @ memory
    x_aug = LAMBDA * v1 + (1.0 - LAMBDA) * v2
    top2 = jnp.argsort(-s2, axis=-1)[..., :2]
    pos = memory[top2[..., 0]]
    neg = memory[top2[..., 1]]
    return x_aug, x, pos, neg, neg


if __name__ == "__main__":
    num_nodes, mem_num, mem_dim = 170, 100, 64   # module defaults

    key = jax.random.PRNGKey(0)
    k_mem, k_we1, k_we2, k_x = jax.random.split(key, 4)

    memory = _xavier_normal(k_mem, (mem_num, mem_dim))
    _we1 = _xavier_normal(k_we1, (num_nodes, mem_num))  # in module, unused in forward
    _we2 = _xavier_normal(k_we2, (num_nodes, mem_num))  # in module, unused in forward

    batch, nodes = 2, 8
    x = jax.random.normal(k_x, (batch, nodes, mem_dim), dtype=jnp.float32)

    # Exact-parity path (f32 matmuls, exact reciprocal): checked tightly.
    outs_f32 = memory_augmented_forward(x, memory, compute_dtype=jnp.float32)
    jax.block_until_ready(outs_f32)
    x_aug, query, pos, neg1, neg2 = outs_f32

    r_aug, _, r_pos, r_neg, _ = _reference(x, memory)
    assert x_aug.shape == x.shape
    assert jnp.allclose(x_aug, r_aug, atol=1e-3), "X_aug mismatch"
    assert jnp.allclose(query, x), "query mismatch"
    assert jnp.allclose(pos, r_pos, atol=1e-5), "pos mismatch"
    assert jnp.allclose(neg1, r_neg, atol=1e-5), "neg1 mismatch"
    assert jnp.allclose(neg2, r_neg, atol=1e-5), "neg2 mismatch"

    # Fast default path: bf16 MXU inputs, f32 accumulation / softmax / blend.
    outs_bf16 = memory_augmented_forward(x, memory)
    jax.block_until_ready(outs_bf16)
    assert outs_bf16[0].shape == x.shape
    assert jnp.allclose(outs_bf16[0], r_aug, atol=5e-2), "bf16 X_aug mismatch"

    print("KERNEL_OK")
</pallas_src>

<mosaic_0001>
module attributes {stable_mosaic.version = 11 : i64} {
  func.func @_memory_kernel(%arg0: i32, %arg1: memref<8x64xf32, #tpu.memory_space<vmem>>, %arg2: memref<128x64xf32, #tpu.memory_space<vmem>>, %arg3: memref<64x128xf32, #tpu.memory_space<vmem>>, %arg4: memref<1x128xf32, #tpu.memory_space<vmem>>, %arg5: memref<8x192xf32, #tpu.memory_space<vmem>>) attributes {dimension_semantics = [#tpu.dimension_semantics<parallel>], iteration_bounds = array<i64: 2>, scalar_prefetch = 0 : i64, scratch_operands = 0 : i64, tpu.core_type = #tpu.core_type<tc>, window_params = [{transform_indices = @transform_0, window_bounds = array<i64: 8, 64>}, {pipeline_mode = #tpu.pipeline_mode<synchronous>, transform_indices = @transform_1, window_bounds = array<i64: 128, 64>}, {pipeline_mode = #tpu.pipeline_mode<synchronous>, transform_indices = @transform_2, window_bounds = array<i64: 64, 128>}, {pipeline_mode = #tpu.pipeline_mode<synchronous>, transform_indices = @transform_3, window_bounds = array<i64: 1, 128>}, {transform_indices = @transform_4, window_bounds = array<i64: 8, 192>}]} {
    %c0 = arith.constant 0 : index
    %c0_0 = arith.constant 0 : index
    %0 = vector.load %arg1[%c0, %c0_0] : memref<8x64xf32, #tpu.memory_space<vmem>>, vector<8x64xf32>
    %c0_1 = arith.constant 0 : index
    %c0_2 = arith.constant 0 : index
    %1 = vector.load %arg2[%c0_1, %c0_2] : memref<128x64xf32, #tpu.memory_space<vmem>>, vector<128x64xf32>
    %c0_3 = arith.constant 0 : index
    %c0_4 = arith.constant 0 : index
    %2 = vector.load %arg3[%c0_3, %c0_4] : memref<64x128xf32, #tpu.memory_space<vmem>>, vector<64x128xf32>
    %c0_5 = arith.constant 0 : index
    %c0_6 = arith.constant 0 : index
    %3 = vector.load %arg4[%c0_5, %c0_6] : memref<1x128xf32, #tpu.memory_space<vmem>>, vector<1x128xf32>
    %cst = arith.constant dense<0.000000e+00> : vector<8x128xf32>
    %4 = tpu.matmul %0, %2, %cst {dimension_numbers = #tpu.dot_dimension_numbers<[1], [0], [0], [1], [0, 0, 1, 1], [], []>} : vector<8x64xf32>, vector<64x128xf32>, vector<8x128xf32> -> vector<8x128xf32>
    %5 = vector.broadcast %3 : vector<1x128xf32> to vector<8x128xf32>
    %6 = arith.addf %4, %5 : vector<8x128xf32>
    %cst_7 = arith.constant dense<0xFF800000> : vector<8xf32>
    %7 = vector.multi_reduction <maximumf>, %6, %cst_7 [1] : vector<8x128xf32> to vector<8xf32>
    %8 = vector.shape_cast %7 : vector<8xf32> to vector<8x1xf32>
    %9 = vector.broadcast %8 : vector<8x1xf32> to vector<8x128xf32>
    %10 = arith.subf %6, %9 : vector<8x128xf32>
    %11 = math.exp %10 : vector<8x128xf32>
    %cst_8 = arith.constant dense<0.000000e+00> : vector<8xf32>
    %12 = vector.multi_reduction <add>, %11, %cst_8 [1] : vector<8x128xf32> to vector<8xf32>
    %13 = vector.shape_cast %12 : vector<8xf32> to vector<8x1xf32>
    %14 = tpu.reciprocal %13 : vector<8x1xf32> -> vector<8x1xf32>
    %15 = vector.broadcast %14 : vector<8x1xf32> to vector<8x128xf32>
    %16 = arith.mulf %11, %15 : vector<8x128xf32>
    %cst_9 = arith.constant dense<0.000000e+00> : vector<8x64xf32>
    %17 = tpu.matmul %16, %1, %cst_9 {dimension_numbers = #tpu.dot_dimension_numbers<[1], [0], [0], [1], [0, 0, 1, 1], [], []>} : vector<8x128xf32>, vector<128x64xf32>, vector<8x64xf32> -> vector<8x64xf32>
    %cst_10 = arith.constant dense<0.000000e+00> : vector<8x128xf32>
    %18 = tpu.matmul %17, %2, %cst_10 {dimension_numbers = #tpu.dot_dimension_numbers<[1], [0], [0], [1], [0, 0, 1, 1], [], []>} : vector<8x64xf32>, vector<64x128xf32>, vector<8x128xf32> -> vector<8x128xf32>
    %19 = vector.broadcast %3 : vector<1x128xf32> to vector<8x128xf32>
    %20 = arith.addf %18, %19 : vector<8x128xf32>
    %cst_11 = arith.constant dense<0xFF800000> : vector<8xf32>
    %21 = vector.multi_reduction <maximumf>, %20, %cst_11 [1] : vector<8x128xf32> to vector<8xf32>
    %22 = vector.shape_cast %21 : vector<8xf32> to vector<8x1xf32>
    %23 = vector.broadcast %22 : vector<8x1xf32> to vector<8x128xf32>
    %24 = arith.subf %20, %23 : vector<8x128xf32>
    %25 = math.exp %24 : vector<8x128xf32>
    %cst_12 = arith.constant dense<0.000000e+00> : vector<8xf32>
    %26 = vector.multi_reduction <add>, %25, %cst_12 [1] : vector<8x128xf32> to vector<8xf32>
    %27 = vector.shape_cast %26 : vector<8xf32> to vector<8x1xf32>
    %28 = tpu.reciprocal %27 : vector<8x1xf32> -> vector<8x1xf32>
    %29 = vector.broadcast %28 : vector<8x1xf32> to vector<8x128xf32>
    %30 = arith.mulf %25, %29 : vector<8x128xf32>
    %cst_13 = arith.constant dense<0.000000e+00> : vector<8x64xf32>
    %31 = tpu.matmul %30, %1, %cst_13 {dimension_numbers = #tpu.dot_dimension_numbers<[1], [0], [0], [1], [0, 0, 1, 1], [], []>} : vector<8x128xf32>, vector<128x64xf32>, vector<8x64xf32> -> vector<8x64xf32>
    %32 = tpu.iota {dimensions = array<i32: 1>} : vector<1x128xi32>
    %cst_14 = arith.constant dense<0xFF800000> : vector<8xf32>
    %33 = vector.multi_reduction <maximumf>, %20, %cst_14 [1] : vector<8x128xf32> to vector<8xf32>
    %34 = vector.shape_cast %33 : vector<8xf32> to vector<8x1xf32>
    %35 = vector.broadcast %34 : vector<8x1xf32> to vector<8x128xf32>
    %36 = arith.cmpf oeq, %20, %35 : vector<8x128xf32>
    %c128_i32 = arith.constant 128 : i32
    %37 = vector.shape_cast %32 : vector<1x128xi32> to vector<1x128xi32>
    %38 = vector.broadcast %37 : vector<1x128xi32> to vector<8x128xi32>
    %39 = vector.broadcast %c128_i32 : i32 to vector<8x128xi32>
    %40 = arith.select %36, %38, %39 : vector<8x128xi1>, vector<8x128xi32>
    %cst_15 = arith.constant dense<2147483647> : vector<8xi32>
    %41 = vector.multi_reduction <minsi>, %40, %cst_15 [1] : vector<8x128xi32> to vector<8xi32>
    %42 = vector.shape_cast %41 : vector<8xi32> to vector<8x1xi32>
    %43 = vector.broadcast %32 : vector<1x128xi32> to vector<8x128xi32>
    %44 = vector.broadcast %42 : vector<8x1xi32> to vector<8x128xi32>
    %45 = arith.cmpi eq, %43, %44 : vector<8x128xi32>
    %cst_16 = arith.constant 0xFF800000 : f32
    %46 = vector.broadcast %cst_16 : f32 to vector<8x128xf32>
    %47 = arith.select %45, %46, %20 : vector<8x128xi1>, vector<8x128xf32>
    %cst_17 = arith.constant dense<0xFF800000> : vector<8xf32>
    %48 = vector.multi_reduction <maximumf>, %47, %cst_17 [1] : vector<8x128xf32> to vector<8xf32>
    %49 = vector.shape_cast %48 : vector<8xf32> to vector<8x1xf32>
    %50 = vector.broadcast %49 : vector<8x1xf32> to vector<8x128xf32>
    %51 = arith.cmpf oeq, %47, %50 : vector<8x128xf32>
    %c128_i32_18 = arith.constant 128 : i32
    %52 = vector.shape_cast %32 : vector<1x128xi32> to vector<1x128xi32>
    %53 = vector.broadcast %52 : vector<1x128xi32> to vector<8x128xi32>
    %54 = vector.broadcast %c128_i32_18 : i32 to vector<8x128xi32>
    %55 = arith.select %51, %53, %54 : vector<8x128xi1>, vector<8x128xi32>
    %cst_19 = arith.constant dense<2147483647> : vector<8xi32>
    %56 = vector.multi_reduction <minsi>, %55, %cst_19 [1] : vector<8x128xi32> to vector<8xi32>
    %57 = vector.shape_cast %56 : vector<8xi32> to vector<8x1xi32>
    %58 = vector.broadcast %32 : vector<1x128xi32> to vector<8x128xi32>
    %59 = vector.broadcast %57 : vector<8x1xi32> to vector<8x128xi32>
    %60 = arith.cmpi eq, %58, %59 : vector<8x128xi32>
    %61 = tpu.concatenate %45, %60 in 0 : vector<8x128xi1>, vector<8x128xi1> -> vector<16x128xi1>
    %62 = arith.extui %61 : vector<16x128xi1> to vector<16x128xi32>
    %63 = arith.sitofp %62 : vector<16x128xi32> to vector<16x128xf32>
    %cst_20 = arith.constant dense<0.000000e+00> : vector<16x64xf32>
    %64 = tpu.matmul %63, %1, %cst_20 {dimension_numbers = #tpu.dot_dimension_numbers<[1], [0], [0], [1], [0, 0, 1, 1], [], []>} : vector<16x128xf32>, vector<128x64xf32>, vector<16x64xf32> -> vector<16x64xf32>
    %65 = vector.extract_strided_slice %64 {offsets = [0, 0], sizes = [8, 64], strides = [1, 1]} : vector<16x64xf32> to vector<8x64xf32>
    %66 = vector.extract_strided_slice %64 {offsets = [8, 0], sizes = [8, 64], strides = [1, 1]} : vector<16x64xf32> to vector<8x64xf32>
    %cst_21 = arith.constant 0.699999988 : f32
    %67 = vector.broadcast %cst_21 : f32 to vector<8x64xf32>
    %68 = arith.mulf %67, %17 : vector<8x64xf32>
    %cst_22 = arith.constant 3.000000e-01 : f32
    %69 = vector.broadcast %cst_22 : f32 to vector<8x64xf32>
    %70 = arith.mulf %69, %31 : vector<8x64xf32>
    %71 = arith.addf %68, %70 : vector<8x64xf32>
    %c0_23 = arith.constant 0 : index
    %c0_24 = arith.constant 0 : index
    %72 = vector.load %arg5[%c0_23, %c0_24] : memref<8x192xf32, #tpu.memory_space<vmem>>, vector<8x64xf32>
    tpu.vector_store %arg5[%c0_23, %c0_24], %71 {strides = array<i32>} : memref<8x192xf32, #tpu.memory_space<vmem>>, vector<8x64xf32>,
    %c0_25 = arith.constant 0 : index
    %c64 = arith.constant 64 : index
    %73 = vector.load %arg5[%c0_25, %c64] : memref<8x192xf32, #tpu.memory_space<vmem>>, vector<8x64xf32>
    tpu.vector_store %arg5[%c0_25, %c64], %65 {strides = array<i32>} : memref<8x192xf32, #tpu.memory_space<vmem>>, vector<8x64xf32>,
    %c0_26 = arith.constant 0 : index
    %c128 = arith.constant 128 : index
    %74 = vector.load %arg5[%c0_26, %c128] : memref<8x192xf32, #tpu.memory_space<vmem>>, vector<8x64xf32>
    tpu.vector_store %arg5[%c0_26, %c128], %66 {strides = array<i32>} : memref<8x192xf32, #tpu.memory_space<vmem>>, vector<8x64xf32>,
    return
  }
  func.func @transform_0(%arg0: i32) -> (i32, i32) {
    %c0_i32 = arith.constant 0 : i32
    %c0_i32_0 = arith.constant 0 : i32
    return %arg0, %c0_i32 : i32, i32
  }
  func.func @transform_1(%arg0: i32) -> (i32, i32) {
    %c0_i32 = arith.constant 0 : i32
    %c0_i32_0 = arith.constant 0 : i32
    %c0_i32_1 = arith.constant 0 : i32
    return %c0_i32, %c0_i32_0 : i32, i32
  }
  func.func @transform_2(%arg0: i32) -> (i32, i32) {
    %c0_i32 = arith.constant 0 : i32
    %c0_i32_0 = arith.constant 0 : i32
    %c0_i32_1 = arith.constant 0 : i32
    return %c0_i32, %c0_i32_0 : i32, i32
  }
  func.func @transform_3(%arg0: i32) -> (i32, i32) {
    %c0_i32 = arith.constant 0 : i32
    %c0_i32_0 = arith.constant 0 : i32
    %c0_i32_1 = arith.constant 0 : i32
    return %c0_i32, %c0_i32_0 : i32, i32
  }
  func.func @transform_4(%arg0: i32) -> (i32, i32) {
    %c0_i32 = arith.constant 0 : i32
    %c0_i32_0 = arith.constant 0 : i32
    return %arg0, %c0_i32 : i32, i32
  }
}

</mosaic_0001>

<bundles_post_ra>
// kernel: tpu_custom_call.1
= control target key start
LH: loop header
LB: loop body
LE: loop exit
PB: predicated region body
PF: predicated region fallthrough
CT: control target
= control target key end

     0   :  { %9 = vsyncpa [#allocation3], 0  ;;  %s1440_s0 = inlined_call_operand.vmem [shape: f32[16,64], index: 0, kind: input, shape index: {}]   ;;  %s1441_s1 = inlined_call_operand.vmem [shape: f32[128,64], index: 1, kind: input, shape index: {}]   ;;  %s1442_s2 = inlined_call_operand.vmem [shape: f32[64,128], index: 2, kind: input, shape index: {}]   ;;  %s1443_s3 = inlined_call_operand.vmem [shape: f32[1,128], index: 3, kind: input, shape index: {}]   ;;  %s1444_s4 = inlined_call_operand.hbm [shape: f32[16,192], index: 4, kind: output, shape index: {}]  }
   0x1   :  { %11 = vsyncpa [#allocation3 + $0x1], 0  ;;  %s1108_s15 = smov 0   ;;  %s1110_s16 = smov 0  }
   0x2   :  { %s1112_s17 = smov 0   ;;  %s1114_s18 = smov 0  }
   0x3 LB: > { %s1129_s19 = sadd.s32 4294967295, %s1076_s18   ;;  %s733_s20 = sadd.s32 4294967294, %s1076_s18   ;;  %s1076_s18 = sphi %s1114_s18, %s1450_s18   ;;  %s1072_s17 = sphi %s1112_s17, %s1449_s17   ;;  %s1068_s16 = sphi %s1110_s16, %s1448_s16   ;;  %s1064_s15 = sphi %s1108_s15, %s1447_s15  }
   0x4   : > { %s1133_s21 = sadd.s32 1, %s1076_s18   ;;  %s113_s22 = sadd.s32 1, %s1072_s17 }
   0x5   : > { %s110_s23 = ssub.s32 %s1076_s18, %s1133_s21  ;;  %p123_p0 = scmp.ne.s32.totalorder %s1072_s17, %s1068_s16 }
   0x6   : > { %p111_p1 = scmp.eq.s32.totalorder %s110_s23, 0  ;;  %p124_p2 = scmp.eq.s32.totalorder %s1129_s19, 1 }
   0x7   : > { %p129_p3 = scmp.ne.s32.totalorder %s1068_s16, %s1064_s15  ;;  %p130_p4 = scmp.eq.s32.totalorder %s733_s20, 1 }
   0x8   : > { %s1144_s24 = scalar_select %p111_p1, %s1072_s17, %s113_s22  }
   0x9   : > { %p1146_p5 = por %p124_p2, %p123_p0  ;;  %p1150_p6 = por %p130_p4, %p129_p3 }
   0xa   : > { %p736_p7 = scmp.ge.s32.totalorder %s1076_s18, 1  ;;  %p164_p8 = scmp.lt.s32.totalorder %s1076_s18, 3 }
   0xc   : > { %p165_p9 = pnand %p736_p7, %p164_p8 }
   0xd   : > { %p189_p10 = scmp.lt.s32.totalorder (!%p165_p9), %s1129_s19, 1  ;;  %s186_s5 = sand.u32 (!%p165_p9), 1, %s1068_s16  }
   0xe   : > { %168 = sbr.rel (%p165_p9) target bundleno = 2107 (0x83b), region = 36  ;;  %s737_s6 = sshll.u32 (!%p165_p9), %s186_s5, 4 }
   0xf   : > { %s1081_s8 = smov (!%p165_p9), 64   ;;  %s751_s9 = sshll.u32 (!%p165_p9), %s1129_s19, 8 }
  0x10   : > { %s1405_s13 = scalar_lea.hbm (!%p165_p9), %s1444_s4, %s751_s9  ;;  %s660_s14 = scalar_lea.sflag (!%p165_p9), [#allocation3], %s186_s5 }
  0x11   : > { %s1082_s22 = smov (!%p165_p9), [#allocation2]  }
  0x12   : > { %s1020_s23 = sshll.u32 (!%p165_p9), %s1082_s22, 4  ;;  %s1021_s23 = int_to_ptr.vmem [resolvable:$false] %s1020_s23 }
  0x13   : > { %v217_v0 = vld [vmem:[%s1442_s2 + $0x38] sm:$0xff]  ;;  %v1078_v1 = vmov 0.0   ;;  %v216_v2 = vld [vmem:[%s1442_s2 + $0x30] sm:$0xff]  ;;  %vm1079_vm0 = vmmov 0   ;;  %v215_v3 = vld [vmem:[%s1442_s2 + $0x28] sm:$0xff]  ;;  %s190_s7 = scalar_select %p189_p10, %s1129_s19, 1  ;;  %v530_v42 = vlaneseq }
  0x14   : > { %822 = vmatprep.subr.mxu0 %v1078_v1  ;;  %838 = vmatprep.mubr.msk.f32.mxu0 %vm1079_vm0, %v1078_v1  ;;  %v214_v4 = vld [vmem:[%s1442_s2 + $0x20] sm:$0xff]  ;;  %v213_v5 = vld [vmem:[%s1442_s2 + $0x18] sm:$0xff]  ;;  %v212_v6 = vld [vmem:[%s1442_s2 + $0x10] sm:$0xff]  ;;  %vm225_vm1 = vcmask 523264   ;;  %v1080_v57 = vmov 1.0   ;;  %vm656_vm8 = vcmask 1048064  }
  0x15   : > { %823 = vmatpush3.msra.mxu0 %v217_v0  ;;  %841 = vmatprep.subr.mxu1 %v1078_v1  ;;  %s738_s12 = sshll.u32 %s190_s7, 3  ;;  %v211_v7 = vld [vmem:[%s1442_s2 + $0x8] sm:$0xff]  ;;  %v210_v8 = vld [vmem:[%s1442_s2] sm:$0xff]  ;;  %v1219_v14 = vld [vmem:[%s1441_s1 + $0x78] sm:$0xff]  ;;  %v531_v43 = vand.u32 127, %v530_v42  ;;  %s188_s7 = scalar_lea.vmem [#allocation2], %s737_s6 }
  0x16   : > { %824 = vmatprep.subr.mxu0 %v1078_v1  ;;  %873 = vmatprep.mubr.msk.f32.mxu1 %vm1079_vm0, %v1078_v1  ;;  %s192_s28 = scalar_lea.vmem %s1440_s0, %s738_s12  ;;  %v1213_v10 = vld [vmem:[%s1443_s3] ss:$0 sm:$0xff]  ;;  %v1224_v15 = vld [vmem:[%s1441_s1 + $0x70] sm:$0xff]  ;;  %v1231_v16 = vld [vmem:[%s1441_s1 + $0x68] sm:$0xff]  ;;  %s674_s10 = sshll.u32 %s188_s7, 4  ;;  %s675_s10 = int_to_ptr.vmem [resolvable:$true] %s674_s10 }
  0x17   : > { %825 = vmatpush3.msra.mxu0 %v216_v2  ;;  %v193_v9 = vld [vmem:[%s192_s28] sm:$0xff]  ;;  %842 = vmatpush3.msra.mxu1 %v1219_v14  ;;  %v1245_v18 = vld [vmem:[%s1441_s1 + $0x58] sm:$0xff]  ;;  %v1252_v19 = vld [vmem:[%s1441_s1 + $0x50] sm:$0xff]  ;;  %s1016_s20 = scalar_lea.vmem %s675_s10, 256  ;;  %s1022_s19 = scalar_lea.vmem %s1021_s23, 512 }
  0x18   : > { %826 = vmatprep.subr.mxu0 %v1078_v1  ;;  %843 = vmatprep.subr.mxu1 %v1078_v1  ;;  %v1238_v17 = vld [vmem:[%s1441_s1 + $0x60] sm:$0xff]  ;;  %v1259_v20 = vld [vmem:[%s1441_s1 + $0x48] sm:$0xff]  ;;  %v1275_v26 = vld [vmem:[%s1441_s1 + $0x38] sm:$0xff]  ;;  %p1017_p11 = scmp.ne.s32.totalorder %s675_s10, %s1016_s20  ;;  %p1023_p0 = scmp.lt.s32.totalorder %s675_s10, %s1021_s23 }
  0x19   : > { %827 = vmatpush3.msra.mxu0 %v215_v3  ;;  %844 = vmatpush3.msra.mxu1 %v1224_v15  ;;  %v1266_v21 = vld [vmem:[%s1441_s1 + $0x40] sm:$0xff]  ;;  %v1280_v27 = vld [vmem:[%s1441_s1 + $0x30] sm:$0xff]  ;;  %v1287_v28 = vld [vmem:[%s1441_s1 + $0x28] sm:$0xff]  ;;  %p1024_p1 = scmp.lt.s32.totalorder %s1022_s19, %s1016_s20 }
  0x1a   : > { %828 = vmatprep.subr.mxu0 %v1078_v1  ;;  %845 = vmatprep.subr.mxu1 %v1078_v1  ;;  %v1294_v29 = vld [vmem:[%s1441_s1 + $0x20] sm:$0xff]  ;;  %v1301_v30 = vld [vmem:[%s1441_s1 + $0x18] sm:$0xff]  ;;  %v1308_v31 = vld [vmem:[%s1441_s1 + $0x10] sm:$0xff]  ;;  %p1018_p12 = pnand %p1017_p11, %p1146_p5 }
  0x1b   : > { %829 = vmatpush3.msra.mxu0 %v214_v4  ;;  %846 = vmatpush3.msra.mxu1 %v1231_v16  ;;  %v1315_v32 = vld [vmem:[%s1441_s1 + $0x8] sm:$0xff]  ;;  %v1322_v33 = vld [vmem:[%s1441_s1] sm:$0xff]  ;;  %p1025_p2 = por %p1024_p1, %p1023_p0 }
  0x1c   : > { %830 = vmatprep.subr.mxu0 %v1078_v1  ;;  %847 = vmatprep.subr.mxu1 %v1078_v1  ;;  %p1019_p13 = pneg %p1018_p12 }
  0x1d   : > { %831 = vmatpush3.msra.mxu0 %v213_v5  ;;  %848 = vmatpush3.msra.mxu1 %v1238_v17 }
  0x1e   : > { %832 = vmatprep.subr.mxu0 %v1078_v1  ;;  %849 = vmatprep.subr.mxu1 %v1078_v1  ;;  %p1026_p3 = pnand %p1025_p2, %p1019_p13 }
  0x1f   : > { %833 = vmatpush3.msra.mxu0 %v212_v6  ;;  %850 = vmatpush3.msra.mxu1 %v1245_v18 }
  0x20   : > { %834 = vmatprep.subr.mxu0 %v1078_v1  ;;  %851 = vmatprep.subr.mxu1 %v1078_v1 }
  0x21   : > { %835 = vmatpush3.msra.mxu0 %v211_v7  ;;  %852 = vmatpush3.msra.mxu1 %v1252_v19 }
  0x22   : > { %836 = vmatprep.subr.mxu0 %v1078_v1  ;;  %853 = vmatprep.subr.mxu1 %v1078_v1 }
  0x23   : > { %837 = vmatpush3.msra.mxu0 %v210_v8  ;;  %854 = vmatpush3.msra.mxu1 %v1259_v20 }
  0x24   : > { %839 = vmatmul.mubr.msk.f32.vlgmr.msra.gmra.mxu0 %vm225_vm1, %v193_v9  ;;  %876 = vmatprep.subr.mxu0 %v1078_v1 }
  0x25   : > { %877 = vmatpush3.msra.mxu0 %v217_v0  ;;  %892 = vmatprep.mubr.msk.f32.mxu0 %vm1079_vm0, %v1078_v1 }
  0x26   : > { %878 = vmatprep.subr.mxu0 %v1078_v1  ;;  %855 = vmatprep.subr.mxu1 %v1078_v1 }
  0x27   : > { %879 = vmatpush3.msra.mxu0 %v216_v2  ;;  %856 = vmatpush3.msra.mxu1 %v1266_v21 }
  0x28   : > { %880 = vmatprep.subr.mxu0 %v1078_v1  ;;  %857 = vmatprep.subr.mxu1 %v1078_v1 }
  0x29   : > { %881 = vmatpush3.msra.mxu0 %v215_v3  ;;  %858 = vmatpush3.msra.mxu1 %v1275_v26 }
  0x2a   : > { %882 = vmatprep.subr.mxu0 %v1078_v1  ;;  %859 = vmatprep.subr.mxu1 %v1078_v1 }
  0x2b   : > { %883 = vmatpush3.msra.mxu0 %v214_v4  ;;  %860 = vmatpush3.msra.mxu1 %v1280_v27 }
  0x2c   : > { %884 = vmatprep.subr.mxu0 %v1078_v1  ;;  %861 = vmatprep.subr.mxu1 %v1078_v1 }
  0x2d   : > { %885 = vmatpush3.msra.mxu0 %v213_v5  ;;  %862 = vmatpush3.msra.mxu1 %v1287_v28 }
  0x2e   : > { %886 = vmatprep.subr.mxu0 %v1078_v1  ;;  %863 = vmatprep.subr.mxu1 %v1078_v1 }
  0x2f   : > { %887 = vmatpush3.msra.mxu0 %v212_v6  ;;  %864 = vmatpush3.msra.mxu1 %v1294_v29 }
  0x30   : > { %888 = vmatprep.subr.mxu0 %v1078_v1  ;;  %865 = vmatprep.subr.mxu1 %v1078_v1 }
  0x31   : > { %889 = vmatpush3.msra.mxu0 %v211_v7  ;;  %866 = vmatpush3.msra.mxu1 %v1301_v30 }
  0x32   : > { %890 = vmatprep.subr.mxu0 %v1078_v1  ;;  %867 = vmatprep.subr.mxu1 %v1078_v1 }
  0x33   : > { %891 = vmatpush3.msra.mxu0 %v210_v8  ;;  %868 = vmatpush3.msra.mxu1 %v1308_v31 }
  0x34   : > { %895 = vmatprep.subr.mxu0 %v1078_v1  ;;  %869 = vmatprep.subr.mxu1 %v1078_v1 }
  0x35   : > { %870 = vmatpush3.msra.mxu1 %v1315_v32 }
  0x36   : > { %871 = vmatprep.subr.mxu1 %v1078_v1 }
  0x37   : > { %872 = vmatpush3.msra.mxu1 %v1322_v33 }
  0x38   : > { %930 = vmatprep.subr.mxu1 %v1219_v14 }
  0xe4   : > { %v295_v11 = vpop.f32.mrf.mxu0 }
  0xe5   : > { %v296_v12 = vadd.f32 %v1213_v10, %v295_v11 }
  0xe6   : > { %v840_v13 = vpop.f32.mrf.mxu0 }
  0xe7   : > { %299 = vmax.xlane.f32.xlu0 %v296_v12 }
 0x170   : > { %v300_v22 = vpop.xlane.xlu0 %299 }
 0x171   : > { %v301_v23 = vsub.f32 %v296_v12, %v300_v22 }
 0x173   : > { %v302_v24 = vmul.f32 1.442695, %v301_v23 }
 0x175   : > { %1008 = vpow2.f32 %v302_v24 }
 0x182   : > { %v1009_v25 = vpop.eup %1008 }
 0x183   : > { %304 = vadd.xlane.f32.xlu0 %v1009_v25 }
 0x20c   : > { %v305_v34 = vpop.xlane.xlu0 %304 }
 0x20d   : > { %1010 = vrcp.f32 %v305_v34 }
 0x21a   : > { %v1011_v35 = vpop.eup %1010 }
 0x21b   : > { %v307_v36 = vmul.f32 %v1011_v35, %v1009_v25 }
 0x21d   : > { %874 = vmatmul.mubr.f32.vlgmr.msra.gmra.mxu1 %v307_v36 }
 0x21e   : > { %931 = vmatpush3.msra.mxu1 %v1219_v14 }
 0x21f   : > { %932 = vmatprep.subr.mxu1 %v1224_v15 }
 0x220   : > { %933 = vmatpush3.msra.mxu1 %v1224_v15 }
 0x221   : > { %934 = vmatprep.subr.mxu1 %v1231_v16 }
 0x222   : > { %935 = vmatpush3.msra.mxu1 %v1231_v16 }
 0x223   : > { %936 = vmatprep.subr.mxu1 %v1238_v17 }
 0x224   : > { %937 = vmatpush3.msra.mxu1 %v1238_v17 }
 0x225   : > { %938 = vmatprep.subr.mxu1 %v1245_v18 }
 0x226   : > { %939 = vmatpush3.msra.mxu1 %v1245_v18 }
 0x227   : > { %940 = vmatprep.subr.mxu1 %v1252_v19 }
 0x228   : > { %941 = vmatpush3.msra.mxu1 %v1252_v19 }
 0x229   : > { %942 = vmatprep.subr.mxu1 %v1259_v20 }
 0x22a   : > { %943 = vmatpush3.msra.mxu1 %v1259_v20 }
 0x22b   : > { %944 = vmatprep.subr.mxu1 %v1266_v21 }
 0x22c   : > { %945 = vmatpush3.msra.mxu1 %v1266_v21 }
 0x22d   : > { %946 = vmatprep.subr.mxu1 %v1275_v26 }
 0x22e   : > { %947 = vmatpush3.msra.mxu1 %v1275_v26 }
 0x22f   : > { %948 = vmatprep.subr.mxu1 %v1280_v27 }
 0x230   : > { %949 = vmatpush3.msra.mxu1 %v1280_v27 }
 0x231   : > { %950 = vmatprep.subr.mxu1 %v1287_v28 }
 0x232   : > { %951 = vmatpush3.msra.mxu1 %v1287_v28 }
 0x233   : > { %952 = vmatprep.subr.mxu1 %v1294_v29 }
 0x234   : > { %953 = vmatpush3.msra.mxu1 %v1294_v29 }
 0x235   : > { %954 = vmatprep.subr.mxu1 %v1301_v30 }
 0x236   : > { %955 = vmatpush3.msra.mxu1 %v1301_v30 }
 0x237   : > { %956 = vmatprep.subr.mxu1 %v1308_v31 }
 0x238   : > { %957 = vmatpush3.msra.mxu1 %v1308_v31 }
 0x239   : > { %958 = vmatprep.subr.mxu1 %v1315_v32 }
 0x23a   : > { %959 = vmatpush3.msra.mxu1 %v1315_v32 }
 0x23b   : > { %960 = vmatprep.subr.mxu1 %v1322_v33 }
 0x23c   : > { %961 = vmatpush3.msra.mxu1 %v1322_v33 }
 0x2dd   : > { %v1359_v37 = vpop.f32.mrf.mxu1 }
 0x2de   : > { %893 = vmatmul.mubr.msk.f32.vlgmr.msra.gmra.mxu0 %vm225_vm1, %v1359_v37 }
 0x2df   : > { %v875_v38 = vpop.f32.mrf.mxu1  ;;  %896 = vmatpush3.msra.mxu0 %v1219_v14  ;;  %927 = vmatprep.mubr.msk.f32.mxu0 %vm1079_vm0, %v1078_v1 }
 0x2e0   : > { %897 = vmatprep.subr.mxu0 %v1078_v1 }
 0x2e1   : > { %898 = vmatpush3.msra.mxu0 %v1224_v15  ;;  %v648_v15 = vmul.f32 0.7, %v1359_v37 }
 0x2e2   : > { %899 = vmatprep.subr.mxu0 %v1078_v1 }
 0x2e3   : > { %900 = vmatpush3.msra.mxu0 %v1231_v16 }
 0x2e4   : > { %901 = vmatprep.subr.mxu0 %v1078_v1 }
 0x2e5   : > { %902 = vmatpush3.msra.mxu0 %v1238_v17 }
 0x2e6   : > { %903 = vmatprep.subr.mxu0 %v1078_v1 }
 0x2e7   : > { %904 = vmatpush3.msra.mxu0 %v1245_v18 }
 0x2e8   : > { %905 = vmatprep.subr.mxu0 %v1078_v1 }
 0x2e9   : > { %906 = vmatpush3.msra.mxu0 %v1252_v19 }
 0x2ea   : > { %907 = vmatprep.subr.mxu0 %v1078_v1 }
 0x2eb   : > { %908 = vmatpush3.msra.mxu0 %v1259_v20 }
 0x2ec   : > { %909 = vmatprep.subr.mxu0 %v1078_v1 }
 0x2ed   : > { %910 = vmatpush3.msra.mxu0 %v1266_v21 }
 0x2ee   : > { %911 = vmatprep.subr.mxu0 %v1078_v1 }
 0x2ef   : > { %912 = vmatpush3.msra.mxu0 %v1275_v26 }
 0x2f0   : > { %913 = vmatprep.subr.mxu0 %v1078_v1 }
 0x2f1   : > { %914 = vmatpush3.msra.mxu0 %v1280_v27 }
 0x2f2   : > { %915 = vmatprep.subr.mxu0 %v1078_v1 }
 0x2f3   : > { %916 = vmatpush3.msra.mxu0 %v1287_v28 }
 0x2f4   : > { %917 = vmatprep.subr.mxu0 %v1078_v1 }
 0x2f5   : > { %918 = vmatpush3.msra.mxu0 %v1294_v29 }
 0x2f6   : > { %919 = vmatprep.subr.mxu0 %v1078_v1 }
 0x2f7   : > { %920 = vmatpush3.msra.mxu0 %v1301_v30 }
 0x2f8   : > { %921 = vmatprep.subr.mxu0 %v1078_v1 }
 0x2f9   : > { %922 = vmatpush3.msra.mxu0 %v1308_v31 }
 0x2fa   : > { %923 = vmatprep.subr.mxu0 %v1078_v1 }
 0x2fb   : > { %924 = vmatpush3.msra.mxu0 %v1315_v32 }
 0x2fc   : > { %925 = vmatprep.subr.mxu0 %v1078_v1 }
 0x2fd   : > { %926 = vmatpush3.msra.mxu0 %v1322_v33 }
 0x39e   : > { %v447_v39 = vpop.f32.mrf.mxu0 }
 0x39f   : > { %v448_v40 = vadd.f32 %v1213_v10, %v447_v39 }
 0x3a0   : > { %v894_v41 = vpop.f32.mrf.mxu0 }
 0x3a1   : > { %451 = vmax.xlane.f32.xlu1 %v448_v40 }
 0x42a   : > { %v452_v44 = vpop.xlane.xlu1 %451 }
 0x42b   : > { %vm532_vm2 = vcmp.eq.f32.partialorder %v448_v40, %v452_v44  ;;  %v453_v59 = vsub.f32 %v448_v40, %v452_v44 }
 0x42c   : > { %v533_v45 = vsel %vm532_vm2, %v531_v43, 128 }
 0x42d   : > { %v535_v46 = vshra.s32 %v533_v45, 16  ;;  %v534_v48 = vand.u32 65535, %v533_v45  ;;  %v454_v60 = vmul.f32 1.442695, %v453_v59 }
 0x42f   : > { %v537_v47 = vcvt.s32.f32 %v535_v46  ;;  %v536_v50 = vcvt.s32.f32 %v534_v48  ;;  %1012 = vpow2.f32 %v454_v60 }
 0x431   : > { %538 = vmin.xlane.f32.xlu1 %v537_v47 }
 0x43c   : > { %v1013_v1 = vpop.eup %1012 }
 0x4ba   : > { %v539_v49 = vpop.xlane.xlu1 %538 }
 0x4bb   : > { %vm540_vm3 = vcmp.eq.f32.partialorder %v537_v47, %v539_v49  ;;  %v545_v52 = vcvt.f32.s32 %v539_v49 }
 0x4bc   : > { %v541_v51 = vsel %vm540_vm3, %v536_v50, inf }
 0x4bd   : > { %542 = vmin.xlane.f32.xlu0 %v541_v51  ;;  %v546_v54 = vshll.u32 %v545_v52, 16 }
 0x546   : > { %v543_v53 = vpop.xlane.xlu0 %542 }
 0x547   : > { %v544_v55 = vcvt.f32.s32 %v543_v53 }
 0x549   : > { %v547_v56 = vadd.s32 %v546_v54, %v544_v55 }
 0x54b   : > { %vm548_vm4 = vcmp.eq.s32.totalorder %v531_v43, %v547_v56 }
 0x54c   : > { %962 = vmatprep.mubr.msk.f32.mxu1 %vm548_vm4, %v1080_v57  ;;  %v549_v58 = vsel %vm548_vm4, -inf, %v448_v40 }
 0x54d   : > { %550 = vmax.xlane.f32.xlu1 %v549_v58 }
 0x5d6   : > { %v551_v61 = vpop.xlane.xlu1 %550 }
 0x5d7   : > { %vm552_vm5 = vcmp.eq.f32.partialorder %v549_v58, %v551_v61 }
 0x5d8   : > { %v553_v62 = vsel %vm552_vm5, %v531_v43, 128 }
 0x5d9   : > { %v555_v63 = vshra.s32 %v553_v62, 16  ;;  %v554_v2 = vand.u32 65535, %v553_v62 }
 0x5db   : > { %v557_v0 = vcvt.s32.f32 %v555_v63  ;;  %v556_v4 = vcvt.s32.f32 %v554_v2 }
 0x5dd   : > { %558 = vmin.xlane.f32.xlu0 %v557_v0 }
 0x5e1   : > { %456 = vadd.xlane.f32.xlu0 %v1013_v1 }
 0x666   : > { %v559_v3 = vpop.xlane.xlu0 %558 }
 0x667   : > { %vm560_vm6 = vcmp.eq.f32.partialorder %v557_v0, %v559_v3  ;;  %v565_v9 = vcvt.f32.s32 %v559_v3 }
 0x668   : > { %v561_v5 = vsel %vm560_vm6, %v556_v4, inf }
 0x669   : > { %562 = vmin.xlane.f32.xlu1 %v561_v5  ;;  %v566_v11 = vshll.u32 %v565_v9, 16 }
 0x66a   : > { %v457_v6 = vpop.xlane.xlu0 %456 }
 0x66b   : > { %1014 = vrcp.f32 %v457_v6 }
 0x678   : > { %v1015_v7 = vpop.eup %1014 }
 0x679   : > { %v459_v8 = vmul.f32 %v1015_v7, %v1013_v1 }
 0x67b   : > { %928 = vmatmul.mubr.f32.vlgmr.msra.gmra.mxu0 %v459_v8 }
 0x6f2   : > { %v563_v10 = vpop.xlane.xlu1 %562 }
 0x6f3   : > { %v564_v12 = vcvt.f32.s32 %v563_v10 }
 0x6f5   : > { %v567_v13 = vadd.s32 %v566_v11, %v564_v12 }
 0x6f7   : > { %vm568_vm7 = vcmp.eq.s32.totalorder %v531_v43, %v567_v13 }
 0x6f8   : > { %963 = vmatmul.mubr.msk.f32.vlgmr.msra.gmra.mxu1 %vm568_vm7, %v1080_v57 }
 0x73b   : > { %v526_v14 = vpop.f32.mrf.mxu0 }
 0x73c   : > { %v649_v16 = vmul.f32 0.3, %v526_v14 }
 0x73d   : > { %v929_v17 = vpop.f32.mrf.mxu0 }
 0x73e   : > { %v650_v18 = vadd.f32 %v649_v16, %v648_v15 }
 0x740   : > { %651 = vst.msk [vmem:[%s188_s7] sm:$0xff] %vm225_vm1, %v650_v18 }
 0x7b8   : > { %v964_v19 = vpop.f32.mrf.mxu1 }
 0x7b9   : > { %658 = vst.msk [vmem:[%s188_s7 + $0x8] sm:$0xff] %vm225_vm1, %v964_v19 }
 0x7ba   : > { %v639_v20 = vpop.f32.mrf.mxu1 }
 0x7bb   : > { %653 = vrot.lane.b32.xlu1 %v639_v20, %s1081_s8 }
 0x82d   : > { %v654_v21 = vpop.permute.xlu1 %653 }
 0x82e   : > { %657 = vst.msk [vmem:[%s188_s7] sm:$0xff] %vm656_vm8, %v654_v21 }
 0x82f   : > { %1029 = shalt.err (!%p1026_p3)
}
 0x830   : > { %s1030_s27 = scalar_lea.hbm %s1405_s13, 256  ;;  %s1034_s30 = scalar_lea.hbm %s1444_s4, 512 }
 0x831   : > { %p1031_p4 = scmp.ne.s32.totalorder %s1405_s13, %s1030_s27  ;;  %p1035_p9 = scmp.lt.s32.totalorder %s1405_s13, %s1444_s4 }
 0x832   : > { %p1036_p10 = scmp.lt.s32.totalorder %s1034_s30, %s1030_s27 }
 0x833   : > { %p1032_p7 = pnand %p1031_p4, %p1146_p5 }
 0x834   : > { %p1037_p11 = por %p1036_p10, %p1035_p9 }
 0x835   : > { %p1033_p8 = pneg %p1032_p7 }
 0x837   : > { %p1038_p12 = pnand %p1037_p11, %p1033_p8 }
 0x839   : > { %1041 = shalt.err (!%p1038_p12)
}
 0x83a   : > { %965 = dma.vmem_to_hbm [thread:$0]  (%p1146_p5), %s675_s10, 256, %s1405_s13, %s660_s14  }
 0x83b PF: > { %p971_p13 = scmp.ge.s32.totalorder %s1076_s18, 2  ;;  %s686_s7 = sand.u32 1, %s1064_s15  }
 0x83c   : > { %s687_s8 = scalar_lea.sflag [#allocation3], %s686_s7 }
 0x83d   : > { %p968_p0 = pnand %p971_p13, %p1150_p6 }
 0x83f   : > { %p969_p1 = pneg %p968_p0 }
 0x841   : > { %1059 = dma.done.wait (%p969_p1), %s687_s8, 256  }
 0x842   : > { %1061 = vsyncadd (%p969_p1), %s687_s8, 4294967040  ;;  %p14_p2 = scmp.ge.s32.totalorder %s1133_s21, 4   ;;  %s1447_s15 = smov %s1068_s16 }
 0x843   : > { %s1448_s16 = smov %s1072_s17  ;;  %s1449_s17 = smov %s1144_s24 }
 0x844   : > { %s1450_s18 = smov %s1133_s21  ;;  %16 = sbr.rel (!%p14_p2) target bundleno = 3 (0x3), region = 71 }
 0x849   :  { %692 = vsyncpa [#allocation3], 1 }
 0x84a   :  { %694 = vsyncpa [#allocation3 + $0x1], 1 }

</bundles_post_ra>
